<compile_context>
chip_gen: v6e
topology: v6e:2x2x1
jax: 0.10.0
libtpu: 0.0.40
codegen_flags: <defaults>
</compile_context>

<pallas_src>
import math

import jax
import jax.numpy as jnp
from jax.experimental import pallas as pl
from jax.experimental.pallas import tpu as pltpu


# lhs (M, K) x rhs (N, K) -> (M, N): MXU consumes the batch-major rhs
# transposed, so no HBM/VMEM transpose of the inputs is ever materialized.
_NT_DIMS = (((1,), (1,)), ((), ()))


def _round_up(x, m):
    return ((x + m - 1) // m) * m


def _cdiv(a, b):
    return -(-a // b)


def _make_kernel(n_later, bias_offsets, bias_sizes, mm_dtype, act_dtype):
    def silu(x):
        # x * sigmoid(x) == x * (0.5 + 0.5 * tanh(x / 2)):
        # one EUP op instead of exp + reciprocal/divide.
        return x * (0.5 * jnp.tanh(0.5 * x) + 0.5)

    def kernel(t_ref, freq_ref, phase_ref, x_ref, w_sc_ref, w_trig_ref, *rest):
        out_ref = rest[-1]
        if n_later:
            w_refs = rest[:n_later]
            b_ref = rest[n_later]
        else:
            w_refs, b_ref = (), None

        # Time-embedding rows [sin(2*pi*W*t); cos(2*pi*W*t); 1] from a single
        # sin(): frequencies/phases were stacked in the wrapper (f32 math so
        # the large trig arguments stay accurate).
        t = t_ref[...]                                        # (1, Bb) f32
        trig = jnp.sin(freq_ref[...] * t + phase_ref[...])    # (E2p1, Bb) f32

        # Fused first layer: 2 MXU dots + 1 add; layer-0 bias folded into the
        # last column of w_trig (multiplies the ones row of `trig`).
        h = jax.lax.dot_general(w_sc_ref[...], x_ref[...], _NT_DIMS,
                                preferred_element_type=jnp.float32)
        h = h + jnp.dot(w_trig_ref[...], trig.astype(mm_dtype),
                        preferred_element_type=jnp.float32)

        # Remaining block-diagonal fused layers.  SiLU on hidden layers only;
        # the "-v_p" negation is folded into the last layer's p block.
        for l in range(n_later):
            a = silu(h.astype(act_dtype))          # bf16 on v6e/v7x fast path
            h = jnp.dot(w_refs[l][...], a.astype(mm_dtype),
                        preferred_element_type=jnp.float32)
            h = h + b_ref[pl.ds(bias_offsets[l], bias_sizes[l]), :]

        out_ref[...] = h.astype(out_ref.dtype)

    return kernel


def _prepare_fused_params(params, nd, n_cond, mm_dtype):
    """Build transposed, q/p-fused weights for the batch-on-lanes layout."""
    e_half = int(params["W"].shape[0])
    q_mlp = list(params["q_mlp"])
    p_mlp = list(params["p_mlp"])
    n_layers = len(q_mlp)

    # Fold the final "-v_p" into the p-branch's last layer.
    wl, bl = p_mlp[-1]
    p_mlp[-1] = (-wl, -bl)

    wq0, bq0 = q_mlp[0]
    wp0, bp0 = p_mlp[0]
    h0 = wq0.shape[1]
    two_nd = 2 * nd
    k_sc = two_nd + n_cond

    # First layer, state(+cond) part.  x_sc columns: [q(nd), p(nd), cond].
    # Torch-MLP input rows: [p-or-q (nd), cond, sin, cos].
    w_sc = jnp.zeros((2 * h0, k_sc), jnp.float32)
    w_sc = w_sc.at[:h0, nd:two_nd].set(wq0[:nd].T)       # q-dynamics reads p
    w_sc = w_sc.at[h0:, :nd].set(wp0[:nd].T)             # p-dynamics reads q
    if n_cond:
        w_sc = w_sc.at[:h0, two_nd:].set(wq0[nd:nd + n_cond].T)
        w_sc = w_sc.at[h0:, two_nd:].set(wp0[nd:nd + n_cond].T)

    # First layer, [sin; cos; 1] part, bias folded into the last column.
    s0, c0 = nd + n_cond, nd + n_cond + e_half
    e2p1 = 2 * e_half + 1
    w_trig = jnp.zeros((2 * h0, e2p1), jnp.float32)
    w_trig = w_trig.at[:h0, :e_half].set(wq0[s0:c0].T)
    w_trig = w_trig.at[:h0, e_half:2 * e_half].set(wq0[c0:].T)
    w_trig = w_trig.at[h0:, :e_half].set(wp0[s0:c0].T)
    w_trig = w_trig.at[h0:, e_half:2 * e_half].set(wp0[c0:].T)
    w_trig = w_trig.at[:h0, -1].set(bq0)
    w_trig = w_trig.at[h0:, -1].set(bp0)

    # sin(freq * t + phase) generates [sin(2*pi*W*t); cos(...); 1].
    w2pi = params["W"].astype(jnp.float32).reshape(-1) * (2.0 * math.pi)
    freqs = jnp.concatenate([w2pi, w2pi, jnp.zeros((1,), jnp.float32)])
    phase = jnp.concatenate(
        [jnp.zeros((e_half,), jnp.float32),
         jnp.full((e_half + 1,), 0.5 * math.pi, jnp.float32)])
    freqs = freqs.reshape(-1, 1)
    phase = phase.reshape(-1, 1)

    # Later layers: block-diagonal q/p fusion; biases packed into one buffer
    # (segments padded to multiples of 8 rows so static offsets stay aligned).
    later_w, bias_chunks, bias_offsets, bias_sizes = [], [], [], []
    off = 0
    for l in range(1, n_layers):
        wq, bq = q_mlp[l]
        wp, bp = p_mlp[l]
        di, do = wq.shape
        w = jnp.zeros((2 * do, 2 * di), jnp.float32)
        w = w.at[:do, :di].set(wq.T)
        w = w.at[do:, di:].set(wp.T)
        later_w.append(w.astype(mm_dtype))
        b = jnp.concatenate([bq, bp]).reshape(-1, 1).astype(jnp.float32)
        size = 2 * do
        pad_rows = _round_up(size, 8) - size
        bias_chunks.append(jnp.pad(b, ((0, pad_rows), (0, 0))))
        bias_offsets.append(off)
        bias_sizes.append(size)
        off += size + pad_rows
    b_packed = jnp.concatenate(bias_chunks, axis=0) if bias_chunks else None

    return dict(
        w_sc=w_sc.astype(mm_dtype), w_trig=w_trig.astype(mm_dtype),
        freqs=freqs, phase=phase, later_w=later_w, b_packed=b_packed,
        bias_offsets=tuple(bias_offsets), bias_sizes=tuple(bias_sizes),
        n_layers=n_layers, e2p1=e2p1)


def symplectic_mlp_forward(t, state, conditional, params, *, block_b=1024,
                           fast=True, bf16_activations=None,
                           min_grid_steps=1, feature_major_output=False):
    """Pallas-backed forward of SymplecticMLP (`params` from `init_params`).

    fast=True            bf16 MXU operands (+bf16 activations) with f32 accum.
    fast=False           pure f32 math.
    bf16_activations     set False on v5e (no bf16 VPU/EUP); default: == fast.
    min_grid_steps       set 2 on v7x so both TensorCores get grid steps.
    feature_major_output return the kernel-native (2*nd, B) layout and skip
                         the wrapper-side output transpose.
    """
    B, two_nd = state.shape
    nd = two_nd // 2
    n_cond = 0 if conditional is None else int(conditional.shape[1])

    mm_dtype = jnp.bfloat16 if fast else jnp.float32
    if bf16_activations is None:
        bf16_activations = fast
    act_dtype = jnp.bfloat16 if (fast and bf16_activations) else jnp.float32

    fused = _prepare_fused_params(params, nd, n_cond, mm_dtype)
    n_later = fused["n_layers"] - 1
    e2p1 = fused["e2p1"]
    k_sc = two_nd + n_cond

    # ---- batch tiling: batch sits on the lane axis inside the kernel ------
    bb = _round_up(max(128, min(int(block_b), _round_up(B, 128))), 128)
    nb = max(_cdiv(B, bb), int(min_grid_steps))
    bb = _round_up(_cdiv(B, nb), 128)        # rebalance to minimize padding
    B_pad = nb * bb
    pad = B_pad - B

    # ---- inputs stay batch-major: no wrapper-side transposes --------------
    t = jnp.asarray(t, jnp.float32)
    if t.ndim == 0:
        t = jnp.broadcast_to(t, (B,))
    t_row = t.astype(jnp.float32).reshape(1, B)
    x_sc = state if conditional is None else jnp.concatenate(
        [state, conditional], axis=1)
    x_sc = x_sc.astype(mm_dtype)             # halves input DMA bytes when fast
    if pad:
        t_row = jnp.pad(t_row, ((0, 0), (0, pad)))
        x_sc = jnp.pad(x_sc, ((0, pad), (0, 0)))

    inputs = [t_row, fused["freqs"], fused["phase"], x_sc,
              fused["w_sc"], fused["w_trig"], *fused["later_w"]]
    in_specs = [
        pl.BlockSpec((1, bb), lambda i: (0, i)),
        pl.BlockSpec((e2p1, 1), lambda i: (0, 0)),
        pl.BlockSpec((e2p1, 1), lambda i: (0, 0)),
        pl.BlockSpec((bb, k_sc), lambda i: (i, 0)),
        pl.BlockSpec(fused["w_sc"].shape, lambda i: (0, 0)),
        pl.BlockSpec(fused["w_trig"].shape, lambda i: (0, 0)),
    ]
    for w in fused["later_w"]:
        in_specs.append(pl.BlockSpec(w.shape, lambda i: (0, 0)))
    if n_later:
        inputs.append(fused["b_packed"])
        in_specs.append(pl.BlockSpec(fused["b_packed"].shape,
                                     lambda i: (0, 0)))

    # Advisory cost estimate for XLA scheduling.
    h_sizes = [int(fused["w_sc"].shape[0])] + [int(w.shape[0])
                                               for w in fused["later_w"]]
    flops = B_pad * (2 * fused["w_sc"].shape[0] * k_sc
                     + 2 * fused["w_trig"].shape[0] * e2p1
                     + sum(2 * w.shape[0] * w.shape[1]
                           for w in fused["later_w"]))
    transc = B_pad * (e2p1 + sum(h_sizes[:-1]))
    bytes_acc = (int(x_sc.size) * x_sc.dtype.itemsize
                 + int(t_row.size) * 4 + two_nd * B_pad * 4
                 + sum(int(w.size) * w.dtype.itemsize
                       for w in [fused["w_sc"], fused["w_trig"],
                                 *fused["later_w"]]))
    cost = pl.CostEstimate(flops=int(flops), transcendentals=int(transc),
                           bytes_accessed=int(bytes_acc))

    out_t = pl.pallas_call(
        _make_kernel(n_later, fused["bias_offsets"], fused["bias_sizes"],
                     mm_dtype, act_dtype),
        out_shape=jax.ShapeDtypeStruct((two_nd, B_pad), jnp.float32),
        grid=(nb,),
        in_specs=in_specs,
        out_specs=pl.BlockSpec((two_nd, bb), lambda i: (0, i)),
        compiler_params=pltpu.CompilerParams(
            dimension_semantics=("parallel",)),
        cost_estimate=cost,
    )(*inputs)

    if feature_major_output:
        return out_t[:, :B]                  # kernel-native (2*nd, B) layout
    return out_t[:, :B].T


def init_params(key, n_data_dims, n_conditionals, embedding_dimensions, units):
    """Deterministic parameter init mimicking nn.Linear's uniform init."""
    input_dim = n_data_dims + n_conditionals + embedding_dimensions
    output_dim = n_data_dims
    dims = [input_dim] + list(units) + [output_dim]

    def make_mlp(key):
        layers = []
        for i in range(len(dims) - 1):
            key, kw, kb = jax.random.split(key, 3)
            bound = 1.0 / math.sqrt(dims[i])
            w = jax.random.uniform(kw, (dims[i], dims[i + 1]), jnp.float32,
                                   -bound, bound)
            b = jax.random.uniform(kb, (dims[i + 1],), jnp.float32,
                                   -bound, bound)
            layers.append((w, b))
        return layers, key

    key, kw_emb = jax.random.split(key)
    W = jax.random.normal(kw_emb, (embedding_dimensions // 2,),
                          jnp.float32) * 16.0
    q_mlp, key = make_mlp(key)
    p_mlp, key = make_mlp(key)
    return {"W": W, "q_mlp": q_mlp, "p_mlp": p_mlp}


def reference_forward(t, state, conditional, params):
    """Plain-JAX reference matching the PyTorch module's semantics."""
    B = state.shape[0]
    nd = state.shape[1] // 2
    q, p = state[:, :nd], state[:, nd:]
    t = jnp.asarray(t, jnp.float32)
    if t.ndim == 0:
        t = jnp.broadcast_to(t, (B,))
    t_proj = t[:, None] * params["W"][None, :] * 2.0 * math.pi
    t_emb = jnp.concatenate([jnp.sin(t_proj), jnp.cos(t_proj)], axis=1)
    if conditional is not None:
        x_q = jnp.concatenate([p, conditional, t_emb], axis=1)
        x_p = jnp.concatenate([q, conditional, t_emb], axis=1)
    else:
        x_q = jnp.concatenate([p, t_emb], axis=1)
        x_p = jnp.concatenate([q, t_emb], axis=1)

    def mlp(x, layers):
        for i, (w, b) in enumerate(layers):
            x = x @ w + b
            if i < len(layers) - 1:
                x = x * jax.nn.sigmoid(x)
        return x

    v_q = mlp(x_q, params["q_mlp"])
    v_p = -mlp(x_p, params["p_mlp"])
    return jnp.concatenate([v_q, v_p], axis=1)


if __name__ == "__main__":
    n_data_dims = 8
    n_conditionals = 4
    embedding_dimensions = 8
    units = (32, 32)
    B = 16

    key = jax.random.PRNGKey(0)
    key, k_state, k_cond, k_t, k_params, k_params0 = jax.random.split(key, 6)
    params = init_params(k_params, n_data_dims, n_conditionals,
                         embedding_dimensions, units)
    state = jax.random.normal(k_state, (B, 2 * n_data_dims), jnp.float32)
    conditional = jax.random.normal(k_cond, (B, n_conditionals), jnp.float32)
    t = jax.random.uniform(k_t, (B,), jnp.float32)

    ref = reference_forward(t, state, conditional, params)

    # Precise (f32) path: must match the reference tightly.
    out_f32 = jax.block_until_ready(
        symplectic_mlp_forward(t, state, conditional, params, fast=False))
    assert out_f32.shape == (B, 2 * n_data_dims)
    assert jnp.allclose(out_f32, ref, atol=1e-4, rtol=1e-4), "f32 mismatch"

    # Fast path (bf16 MXU operands + bf16 activations): loosened tolerance.
    out_fast = jax.block_until_ready(
        symplectic_mlp_forward(t, state, conditional, params, fast=True))
    assert jnp.allclose(out_fast, ref, atol=5e-2, rtol=5e-2), "bf16 mismatch"

    # conditional=None path with a scalar t (module built w/ n_conditionals=0).
    params0 = init_params(k_params0, n_data_dims, 0, embedding_dimensions,
                          units)
    t_scalar = jnp.float32(0.37)
    ref0 = reference_forward(t_scalar, state, None, params0)
    out0 = jax.block_until_ready(
        symplectic_mlp_forward(t_scalar, state, None, params0, fast=False))
    assert jnp.allclose(out0, ref0, atol=1e-4, rtol=1e-4), "no-cond mismatch"

    # Ragged batch + multi-step grid (exercises padding and the 1-D grid).
    B2 = 300
    key, k_s2, k_t2, k_c2 = jax.random.split(key, 4)
    state2 = jax.random.normal(k_s2, (B2, 2 * n_data_dims), jnp.float32)
    cond2 = jax.random.normal(k_c2, (B2, n_conditionals), jnp.float32)
    t2 = jax.random.uniform(k_t2, (B2,), jnp.float32)
    ref2 = reference_forward(t2, state2, cond2, params)
    out2 = jax.block_until_ready(
        symplectic_mlp_forward(t2, state2, cond2, params, fast=False,
                               block_b=128))
    assert out2.shape == (B2, 2 * n_data_dims)
    assert jnp.allclose(out2, ref2, atol=1e-4, rtol=1e-4), "ragged mismatch"

    # Kernel-native (feature-major) output layout: no wrapper transpose.
    out_fm = jax.block_until_ready(
        symplectic_mlp_forward(t, state, conditional, params, fast=False,
                               feature_major_output=True))
    assert out_fm.shape == (2 * n_data_dims, B)
    assert jnp.allclose(out_fm.T, ref, atol=1e-4, rtol=1e-4), "fm mismatch"

    print("KERNEL_OK")
</pallas_src>

<mosaic_0001>
module attributes {stable_mosaic.version = 11 : i64} {
  func.func @kernel(%arg0: i32, %arg1: memref<1x128xf32, #tpu.memory_space<vmem>>, %arg2: memref<9x1xf32, #tpu.memory_space<vmem>>, %arg3: memref<9x1xf32, #tpu.memory_space<vmem>>, %arg4: memref<128x20xf32, #tpu.memory_space<vmem>>, %arg5: memref<64x20xf32, #tpu.memory_space<vmem>>, %arg6: memref<64x9xf32, #tpu.memory_space<vmem>>, %arg7: memref<64x64xf32, #tpu.memory_space<vmem>>, %arg8: memref<16x64xf32, #tpu.memory_space<vmem>>, %arg9: memref<80x1xf32, #tpu.memory_space<vmem>>, %arg10: memref<16x128xf32, #tpu.memory_space<vmem>>) attributes {dimension_semantics = [#tpu.dimension_semantics<parallel>], iteration_bounds = array<i64: 1>, scalar_prefetch = 0 : i64, scratch_operands = 0 : i64, tpu.core_type = #tpu.core_type<tc>, window_params = [{transform_indices = @transform_0, window_bounds = array<i64: 1, 128>}, {pipeline_mode = #tpu.pipeline_mode<synchronous>, transform_indices = @transform_1, window_bounds = array<i64: 9, 1>}, {pipeline_mode = #tpu.pipeline_mode<synchronous>, transform_indices = @transform_2, window_bounds = array<i64: 9, 1>}, {transform_indices = @transform_3, window_bounds = array<i64: 128, 20>}, {pipeline_mode = #tpu.pipeline_mode<synchronous>, transform_indices = @transform_4, window_bounds = array<i64: 64, 20>}, {pipeline_mode = #tpu.pipeline_mode<synchronous>, transform_indices = @transform_5, window_bounds = array<i64: 64, 9>}, {pipeline_mode = #tpu.pipeline_mode<synchronous>, transform_indices = @transform_6, window_bounds = array<i64: 64, 64>}, {pipeline_mode = #tpu.pipeline_mode<synchronous>, transform_indices = @transform_7, window_bounds = array<i64: 16, 64>}, {pipeline_mode = #tpu.pipeline_mode<synchronous>, transform_indices = @transform_8, window_bounds = array<i64: 80, 1>}, {transform_indices = @transform_9, window_bounds = array<i64: 16, 128>}]} {
    %c0 = arith.constant 0 : index
    %c0_0 = arith.constant 0 : index
    %0 = vector.load %arg1[%c0, %c0_0] : memref<1x128xf32, #tpu.memory_space<vmem>>, vector<1x128xf32>
    %c0_1 = arith.constant 0 : index
    %c0_2 = arith.constant 0 : index
    %1 = vector.load %arg2[%c0_1, %c0_2] : memref<9x1xf32, #tpu.memory_space<vmem>>, vector<9x1xf32>
    %2 = vector.broadcast %1 : vector<9x1xf32> to vector<9x128xf32>
    %3 = vector.broadcast %0 : vector<1x128xf32> to vector<9x128xf32>
    %4 = arith.mulf %2, %3 : vector<9x128xf32>
    %c0_3 = arith.constant 0 : index
    %c0_4 = arith.constant 0 : index
    %5 = vector.load %arg3[%c0_3, %c0_4] : memref<9x1xf32, #tpu.memory_space<vmem>>, vector<9x1xf32>
    %6 = vector.broadcast %5 : vector<9x1xf32> to vector<9x128xf32>
    %7 = arith.addf %4, %6 : vector<9x128xf32>
    %8 = math.sin %7 : vector<9x128xf32>
    %c0_5 = arith.constant 0 : index
    %c0_6 = arith.constant 0 : index
    %9 = vector.load %arg5[%c0_5, %c0_6] : memref<64x20xf32, #tpu.memory_space<vmem>>, vector<64x20xf32>
    %c0_7 = arith.constant 0 : index
    %c0_8 = arith.constant 0 : index
    %10 = vector.load %arg4[%c0_7, %c0_8] : memref<128x20xf32, #tpu.memory_space<vmem>>, vector<128x20xf32>
    %cst = arith.constant dense<0.000000e+00> : vector<64x128xf32>
    %11 = tpu.matmul %9, %10, %cst {dimension_numbers = #tpu.dot_dimension_numbers<[1], [1], [0], [0], [0, 0, 1, 0], [], []>} : vector<64x20xf32>, vector<128x20xf32>, vector<64x128xf32> -> vector<64x128xf32>
    %c0_9 = arith.constant 0 : index
    %c0_10 = arith.constant 0 : index
    %12 = vector.load %arg6[%c0_9, %c0_10] : memref<64x9xf32, #tpu.memory_space<vmem>>, vector<64x9xf32>
    %cst_11 = arith.constant dense<0.000000e+00> : vector<64x128xf32>
    %13 = tpu.matmul %12, %8, %cst_11 {dimension_numbers = #tpu.dot_dimension_numbers<[1], [0], [0], [1], [0, 0, 1, 1], [], []>} : vector<64x9xf32>, vector<9x128xf32>, vector<64x128xf32> -> vector<64x128xf32>
    %14 = arith.addf %11, %13 : vector<64x128xf32>
    %cst_12 = arith.constant 5.000000e-01 : f32
    %15 = vector.broadcast %cst_12 : f32 to vector<64x128xf32>
    %16 = arith.mulf %15, %14 : vector<64x128xf32>
    %17 = math.tanh %16 : vector<64x128xf32>
    %cst_13 = arith.constant 5.000000e-01 : f32
    %18 = vector.broadcast %cst_13 : f32 to vector<64x128xf32>
    %19 = arith.mulf %18, %17 : vector<64x128xf32>
    %cst_14 = arith.constant 5.000000e-01 : f32
    %20 = vector.broadcast %cst_14 : f32 to vector<64x128xf32>
    %21 = arith.addf %19, %20 : vector<64x128xf32>
    %22 = arith.mulf %14, %21 : vector<64x128xf32>
    %c0_15 = arith.constant 0 : index
    %c0_16 = arith.constant 0 : index
    %23 = vector.load %arg7[%c0_15, %c0_16] : memref<64x64xf32, #tpu.memory_space<vmem>>, vector<64x64xf32>
    %cst_17 = arith.constant dense<0.000000e+00> : vector<64x128xf32>
    %24 = tpu.matmul %23, %22, %cst_17 {dimension_numbers = #tpu.dot_dimension_numbers<[1], [0], [0], [1], [0, 0, 1, 1], [], []>} : vector<64x64xf32>, vector<64x128xf32>, vector<64x128xf32> -> vector<64x128xf32>
    %c0_18 = arith.constant 0 : index
    %c0_19 = arith.constant 0 : index
    %25 = vector.load %arg9[%c0_18, %c0_19] : memref<80x1xf32, #tpu.memory_space<vmem>>, vector<64x1xf32>
    %26 = vector.broadcast %25 : vector<64x1xf32> to vector<64x128xf32>
    %27 = arith.addf %24, %26 : vector<64x128xf32>
    %cst_20 = arith.constant 5.000000e-01 : f32
    %28 = vector.broadcast %cst_20 : f32 to vector<64x128xf32>
    %29 = arith.mulf %28, %27 : vector<64x128xf32>
    %30 = math.tanh %29 : vector<64x128xf32>
    %cst_21 = arith.constant 5.000000e-01 : f32
    %31 = vector.broadcast %cst_21 : f32 to vector<64x128xf32>
    %32 = arith.mulf %31, %30 : vector<64x128xf32>
    %cst_22 = arith.constant 5.000000e-01 : f32
    %33 = vector.broadcast %cst_22 : f32 to vector<64x128xf32>
    %34 = arith.addf %32, %33 : vector<64x128xf32>
    %35 = arith.mulf %27, %34 : vector<64x128xf32>
    %c0_23 = arith.constant 0 : index
    %c0_24 = arith.constant 0 : index
    %36 = vector.load %arg8[%c0_23, %c0_24] : memref<16x64xf32, #tpu.memory_space<vmem>>, vector<16x64xf32>
    %cst_25 = arith.constant dense<0.000000e+00> : vector<16x128xf32>
    %37 = tpu.matmul %36, %35, %cst_25 {dimension_numbers = #tpu.dot_dimension_numbers<[1], [0], [0], [1], [0, 0, 1, 1], [], []>} : vector<16x64xf32>, vector<64x128xf32>, vector<16x128xf32> -> vector<16x128xf32>
    %c64 = arith.constant 64 : index
    %c0_26 = arith.constant 0 : index
    %38 = vector.load %arg9[%c64, %c0_26] : memref<80x1xf32, #tpu.memory_space<vmem>>, vector<16x1xf32>
    %39 = vector.broadcast %38 : vector<16x1xf32> to vector<16x128xf32>
    %40 = arith.addf %37, %39 : vector<16x128xf32>
    %c0_27 = arith.constant 0 : index
    %c0_28 = arith.constant 0 : index
    %41 = vector.load %arg10[%c0_27, %c0_28] : memref<16x128xf32, #tpu.memory_space<vmem>>, vector<16x128xf32>
    tpu.vector_store %arg10[%c0_27, %c0_28], %40 {strides = array<i32>} : memref<16x128xf32, #tpu.memory_space<vmem>>, vector<16x128xf32>,
    return
  }
  func.func @transform_0(%arg0: i32) -> (i32, i32) {
    %c0_i32 = arith.constant 0 : i32
    %c0_i32_0 = arith.constant 0 : i32
    return %c0_i32, %arg0 : i32, i32
  }
  func.func @transform_1(%arg0: i32) -> (i32, i32) {
    %c0_i32 = arith.constant 0 : i32
    %c0_i32_0 = arith.constant 0 : i32
    %c0_i32_1 = arith.constant 0 : i32
    return %c0_i32, %c0_i32_0 : i32, i32
  }
  func.func @transform_2(%arg0: i32) -> (i32, i32) {
    %c0_i32 = arith.constant 0 : i32
    %c0_i32_0 = arith.constant 0 : i32
    %c0_i32_1 = arith.constant 0 : i32
    return %c0_i32, %c0_i32_0 : i32, i32
  }
  func.func @transform_3(%arg0: i32) -> (i32, i32) {
    %c0_i32 = arith.constant 0 : i32
    %c0_i32_0 = arith.constant 0 : i32
    return %arg0, %c0_i32 : i32, i32
  }
  func.func @transform_4(%arg0: i32) -> (i32, i32) {
    %c0_i32 = arith.constant 0 : i32
    %c0_i32_0 = arith.constant 0 : i32
    %c0_i32_1 = arith.constant 0 : i32
    return %c0_i32, %c0_i32_0 : i32, i32
  }
  func.func @transform_5(%arg0: i32) -> (i32, i32) {
    %c0_i32 = arith.constant 0 : i32
    %c0_i32_0 = arith.constant 0 : i32
    %c0_i32_1 = arith.constant 0 : i32
    return %c0_i32, %c0_i32_0 : i32, i32
  }
  func.func @transform_6(%arg0: i32) -> (i32, i32) {
    %c0_i32 = arith.constant 0 : i32
    %c0_i32_0 = arith.constant 0 : i32
    %c0_i32_1 = arith.constant 0 : i32
    return %c0_i32, %c0_i32_0 : i32, i32
  }
  func.func @transform_7(%arg0: i32) -> (i32, i32) {
    %c0_i32 = arith.constant 0 : i32
    %c0_i32_0 = arith.constant 0 : i32
    %c0_i32_1 = arith.constant 0 : i32
    return %c0_i32, %c0_i32_0 : i32, i32
  }
  func.func @transform_8(%arg0: i32) -> (i32, i32) {
    %c0_i32 = arith.constant 0 : i32
    %c0_i32_0 = arith.constant 0 : i32
    %c0_i32_1 = arith.constant 0 : i32
    return %c0_i32, %c0_i32_0 : i32, i32
  }
  func.func @transform_9(%arg0: i32) -> (i32, i32) {
    %c0_i32 = arith.constant 0 : i32
    %c0_i32_0 = arith.constant 0 : i32
    return %c0_i32, %arg0 : i32, i32
  }
}

</mosaic_0001>

<bundles_post_ra>
// kernel: tpu_custom_call.1
= control target key start
LH: loop header
LB: loop body
LE: loop exit
PB: predicated region body
PF: predicated region fallthrough
CT: control target
= control target key end

     0   :  { %v1300_v2 = vmov 0   ;;  %s1659_s0 = inlined_call_operand.vmem [shape: f32[1,128], index: 0, kind: input, shape index: {}]   ;;  %s1660_s1 = inlined_call_operand.vmem [shape: f32[9,1], index: 1, kind: input, shape index: {}]   ;;  %s1661_s2 = inlined_call_operand.vmem [shape: f32[9,1], index: 2, kind: input, shape index: {}]   ;;  %s1662_s3 = inlined_call_operand.vmem [shape: f32[128,20], index: 3, kind: input, shape index: {}]   ;;  %s1663_s4 = inlined_call_operand.vmem [shape: f32[64,20], index: 4, kind: input, shape index: {}]   ;;  %s1664_s5 = inlined_call_operand.vmem [shape: f32[64,9], index: 5, kind: input, shape index: {}]   ;;  %s1665_s6 = inlined_call_operand.vmem [shape: f32[64,64], index: 6, kind: input, shape index: {}]   ;;  %s1666_s7 = inlined_call_operand.vmem [shape: f32[16,64], index: 7, kind: input, shape index: {}]   ;;  %s1667_s8 = inlined_call_operand.vmem [shape: f32[80,1], index: 8, kind: input, shape index: {}]   ;;  %s1668_s9 = inlined_call_operand.hbm [shape: f32[16,128], index: 9, kind: output, shape index: {}]  }
   0x1   :  { %v55_v0 = vld [vmem:[%s1661_s2 + $0x8] sm:$0x1]  ;;  %1237 = vset.pattern.permute.xlu1 %v1300_v2  ;;  %1236 = vset.pattern.permute.xlu0 %v1300_v2  ;;  %v54_v3 = vld [vmem:[%s1661_s2] sm:$0xff] }
   0x2   :  { %v35_v1 = vld [vmem:[%s1660_s1 + $0x8] sm:$0x1]  ;;  %63 = vperm.xlu1 %1237, %v55_v0   ;;  %v34_v4 = vld [vmem:[%s1660_s1] sm:$0xff] }
   0x3   :  { %43 = vperm.xlu0 %1236, %v35_v1  }
   0x4   :  { %14 = vsyncpa [#allocation3], 0  ;;  %v674_v5 = vld [vmem:[%s1667_s8 + $0x30] sm:$0xff]  ;;  %v675_v6 = vld [vmem:[%s1667_s8 + $0x38] sm:$0xff]  ;;  %vm442_vm0 = vcmask 162816   ;;  %vm308_vm1 = vcmask 72704  }
   0x5   :  { %v672_v7 = vld [vmem:[%s1667_s8 + $0x20] sm:$0xff]  ;;  %v673_v8 = vld [vmem:[%s1667_s8 + $0x28] sm:$0xff]  ;;  %v670_v9 = vld [vmem:[%s1667_s8 + $0x10] sm:$0xff] }
   0x6   :  { %58 = vperm.xlu1 %1237, %v54_v3   ;;  %v671_v10 = vld [vmem:[%s1667_s8 + $0x18] sm:$0xff]  ;;  %v668_v11 = vld [vmem:[%s1667_s8] sm:$0xff]  ;;  %v669_v12 = vld [vmem:[%s1667_s8 + $0x8] sm:$0xff]  ;;  %v1301_v3 = vmov 683565275  }
   0x7   :  { %38 = vperm.xlu0 %1236, %v34_v4   ;;  %v889_v13 = vld [vmem:[%s1667_s8 + $0x48] sm:$0xff]  ;;  %v888_v14 = vld [vmem:[%s1667_s8 + $0x40] sm:$0xff]  ;;  %v299_v15 = vld [vmem:[%s1662_s3 + $0x78] sm:$0xff]  ;;  %s1307_s8 = smov [#allocation2]  }
   0x8   :  { %1127 = vmatprep.subr.msk.mxu1 %vm442_vm0, %v299_v15  ;;  %v298_v16 = vld [vmem:[%s1662_s3 + $0x70] sm:$0xff]  ;;  %v297_v17 = vld [vmem:[%s1662_s3 + $0x68] sm:$0xff]  ;;  %v296_v18 = vld [vmem:[%s1662_s3 + $0x60] sm:$0xff]  ;;  %s988_s20 = sshll.u32 %s1307_s8, 4  ;;  %s989_s20 = int_to_ptr.vmem [resolvable:$true] %s988_s20 }
   0x9   :  { %1128 = vmatpush3.xpose.msk.msra.mxu1 %vm442_vm0, %v299_v15  ;;  %v295_v19 = vld [vmem:[%s1662_s3 + $0x58] sm:$0xff]  ;;  %v294_v20 = vld [vmem:[%s1662_s3 + $0x50] sm:$0xff]  ;;  %v293_v21 = vld [vmem:[%s1662_s3 + $0x48] sm:$0xff]  ;;  %v1305_v15 = vmov 920167782   ;;  %s1278_s21 = scalar_lea.vmem %s989_s20, 256  ;;  %p1283_p1 = scmp.lt.s32.totalorder %s989_s20, %s989_s20 }
   0xa   :  { %708 = vperm.xlu1 %1237, %v674_v5   ;;  %1129 = vmatprep.subr.msk.mxu1 %vm442_vm0, %v298_v16  ;;  %v292_v22 = vld [vmem:[%s1662_s3 + $0x40] sm:$0xff]  ;;  %v291_v23 = vld [vmem:[%s1662_s3 + $0x38] sm:$0xff]  ;;  %v290_v24 = vld [vmem:[%s1662_s3 + $0x30] sm:$0xff]  ;;  %p1279_p0 = scmp.ne.s32.totalorder %s989_s20, %s1278_s21  ;;  %p1284_p2 = scmp.lt.s32.totalorder %s1278_s21, %s1278_s21 }
   0xb   :  { %713 = vperm.xlu0 %1236, %v675_v6   ;;  %v289_v25 = vld [vmem:[%s1662_s3 + $0x28] sm:$0xff]  ;;  %v288_v26 = vld [vmem:[%s1662_s3 + $0x20] sm:$0xff]  ;;  %v287_v27 = vld [vmem:[%s1662_s3 + $0x18] sm:$0xff]  ;;  %v1302_v6 = vmov 2475754826  }
   0xc   :  { %v286_v28 = vld [vmem:[%s1662_s3 + $0x10] sm:$0xff]  ;;  %v285_v29 = vld [vmem:[%s1662_s3 + $0x8] sm:$0xff]  ;;  %v284_v30 = vld [vmem:[%s1662_s3] sm:$0xff]  ;;  %p1285_p3 = por %p1284_p2, %p1283_p1 }
   0xd   :  { %1130 = vmatpush3.xpose.msk.msra.mxu1 %vm442_vm0, %v298_v16  ;;  %v276_v31 = vld [vmem:[%s1663_s4] sm:$0xff]  ;;  %v277_v32 = vld [vmem:[%s1663_s4 + $0x8] sm:$0xff]  ;;  %v278_v34 = vld [vmem:[%s1663_s4 + $0x10] sm:$0xff] }
   0xe   :  { %698 = vperm.xlu1 %1237, %v672_v7   ;;  %1131 = vmatprep.subr.msk.mxu1 %vm442_vm0, %v297_v17  ;;  %v300_v33 = vld [vmem:[%s1664_s5] sm:$0xff]  ;;  %v279_v35 = vld [vmem:[%s1663_s4 + $0x18] sm:$0xff]  ;;  %v281_v37 = vld [vmem:[%s1663_s4 + $0x28] sm:$0xff]  ;;  %p1286_p4 = pnand %p1285_p3, %p1279_p0 }
   0xf   :  { %703 = vperm.xlu0 %1236, %v673_v8   ;;  %1159 = vmatprep.mubr.msk.f32.mxu1 %vm442_vm0, %v276_v31  ;;  %v280_v36 = vld [vmem:[%s1663_s4 + $0x20] sm:$0xff]  ;;  %v282_v38 = vld [vmem:[%s1663_s4 + $0x30] sm:$0xff]  ;;  %v283_v39 = vld [vmem:[%s1663_s4 + $0x38] sm:$0xff]  ;;  %v1303_v8 = vmov 2131351028  }
  0x10   :  { %1115 = vmatprep.mubr.msk.f32.mxu0 %vm308_vm1, %v300_v33  ;;  %v999_v40 = vld [vmem:[%s1659_s0] ss:$0 sm:$0xff] }
  0x11   :  { %1132 = vmatpush3.xpose.msk.msra.mxu1 %vm442_vm0, %v297_v17 }
  0x12   :  { %688 = vperm.xlu1 %1237, %v670_v9   ;;  %1133 = vmatprep.subr.msk.mxu1 %vm442_vm0, %v296_v18 }
  0x13   :  { %693 = vperm.xlu0 %1236, %v671_v10   ;;  %v1304_v10 = vmov 2102212464  }
  0x15   :  { %1134 = vmatpush3.xpose.msk.msra.mxu1 %vm442_vm0, %v296_v18 }
  0x16   :  { %678 = vperm.xlu1 %1237, %v668_v11   ;;  %1135 = vmatprep.subr.msk.mxu1 %vm442_vm0, %v295_v19 }
  0x17   :  { %683 = vperm.xlu0 %1236, %v669_v12  }
  0x19   :  { %1136 = vmatpush3.xpose.msk.msra.mxu1 %vm442_vm0, %v295_v19 }
  0x1a   :  { %897 = vperm.xlu1 %1237, %v889_v13   ;;  %1137 = vmatprep.subr.msk.mxu1 %vm442_vm0, %v294_v20 }
  0x1b   :  { %892 = vperm.xlu0 %1236, %v888_v14  }
  0x1d   :  { %1138 = vmatpush3.xpose.msk.msra.mxu1 %vm442_vm0, %v294_v20  ;;  %v1306_v20 = vmov 1326507024  }
  0x1e   :  { %1139 = vmatprep.subr.msk.mxu1 %vm442_vm0, %v293_v21 }
  0x21   :  { %1140 = vmatpush3.xpose.msk.msra.mxu1 %vm442_vm0, %v293_v21 }
  0x22   :  { %1141 = vmatprep.subr.msk.mxu1 %vm442_vm0, %v292_v22 }
  0x25   :  { %1142 = vmatpush3.xpose.msk.msra.mxu1 %vm442_vm0, %v292_v22 }
  0x26   :  { %1143 = vmatprep.subr.msk.mxu1 %vm442_vm0, %v291_v23 }
  0x29   :  { %1144 = vmatpush3.xpose.msk.msra.mxu1 %vm442_vm0, %v291_v23 }
  0x2a   :  { %1145 = vmatprep.subr.msk.mxu1 %vm442_vm0, %v290_v24 }
  0x2d   :  { %1146 = vmatpush3.xpose.msk.msra.mxu1 %vm442_vm0, %v290_v24 }
  0x2e   :  { %1147 = vmatprep.subr.msk.mxu1 %vm442_vm0, %v289_v25 }
  0x31   :  { %1148 = vmatpush3.xpose.msk.msra.mxu1 %vm442_vm0, %v289_v25 }
  0x32   :  { %1149 = vmatprep.subr.msk.mxu1 %vm442_vm0, %v288_v26 }
  0x35   :  { %1150 = vmatpush3.xpose.msk.msra.mxu1 %vm442_vm0, %v288_v26 }
  0x36   :  { %1151 = vmatprep.subr.msk.mxu1 %vm442_vm0, %v287_v27 }
  0x39   :  { %1152 = vmatpush3.xpose.msk.msra.mxu1 %vm442_vm0, %v287_v27 }
  0x3a   :  { %1153 = vmatprep.subr.msk.mxu1 %vm442_vm0, %v286_v28 }
  0x3d   :  { %1154 = vmatpush3.xpose.msk.msra.mxu1 %vm442_vm0, %v286_v28 }
  0x3e   :  { %1155 = vmatprep.subr.msk.mxu1 %vm442_vm0, %v285_v29 }
  0x41   :  { %1156 = vmatpush3.xpose.msk.msra.mxu1 %vm442_vm0, %v285_v29 }
  0x42   :  { %1157 = vmatprep.subr.msk.mxu1 %vm442_vm0, %v284_v30 }
  0x45   :  { %1158 = vmatpush3.xpose.msk.msra.mxu1 %vm442_vm0, %v284_v30 }
  0x48   :  { %1160 = vmatmul.mubr.msk.f32.vlgmr.msra.gmra.mxu1 %vm442_vm0, %v277_v32 }
  0x49   :  { %1162 = vmatprep.mubr.msk.f32.mxu1 %vm442_vm0, %v278_v34 }
  0x4c   :  { %1163 = vmatmul.mubr.msk.f32.gmra.mxu1 %vm442_vm0, %v279_v35 }
  0x4d   :  { %1165 = vmatprep.mubr.msk.f32.mxu1 %vm442_vm0, %v280_v36 }
  0x50   :  { %1166 = vmatmul.mubr.msk.f32.gmra.mxu1 %vm442_vm0, %v281_v37 }
  0x51   :  { %1168 = vmatprep.mubr.msk.f32.mxu1 %vm442_vm0, %v282_v38 }
  0x54   :  { %1169 = vmatmul.mubr.msk.f32.gmra.mxu1 %vm442_vm0, %v283_v39 }
  0x7d   :  { %v64_v41 = vpop.permute.xlu1 %63 }
  0x7e   :  { %v44_v42 = vpop.permute.xlu0 %43 }
  0x7f   :  { %v53_v43 = vmul.f32 %v999_v40, %v44_v42 }
  0x81   :  { %v1521_v44 = vadd.f32 %v64_v41, %v53_v43  ;;  %v59_v48 = vpop.permute.xlu1 %58 }
  0x82   :  { %v39_v45 = vpop.permute.xlu0 %38 }
  0x83   :  { %v175_v46 = vand.u32 2139095040, %v1521_v44  ;;  %v52_v47 = vmul.f32 %v999_v40, %v39_v45  ;;  %v172_v51 = vand.u32 2147483647, %v1521_v44  ;;  %vm174_vm0 = vcmp.lt.s32.totalorder %v1521_v44, 0 }
  0x85   :  { %v176_v49 = vshrl.u32 %v175_v46, 23  ;;  %v1524_v50 = vadd.f32 %v59_v48, %v52_v47  ;;  %v179_v57 = vand.u32 8388607, %v172_v51 }
  0x87   :  { %v1004_v52 = vadd.s32 4294967169, %v176_v49  ;;  %v71_v53 = vand.u32 2139095040, %v1524_v50  ;;  %v68_v54 = vand.u32 2147483647, %v1524_v50  ;;  %v180_v63 = vor.u32 8388608, %v179_v57 }
  0x89   :  { %v182_v55 = vadd.s32 1, %v1004_v52  ;;  %v72_v56 = vshrl.u32 %v71_v53, 23  ;;  %v75_v58 = vand.u32 8388607, %v68_v54  ;;  %v220_v34 = vshll.u32 %v180_v63, 8 }
  0x8b   :  { %vm183_vm2 = vcmp.gt.s32.totalorder %v182_v55, 0  ;;  %v1000_v59 = vadd.s32 4294967169, %v72_v56  ;;  %v76_v0 = vor.u32 8388608, %v75_v58 }
  0x8c   :  { %v184_v60 = vsel %vm183_vm2, %v182_v55, 0  ;;  %vm173_vm2 = vcmp.le.f32.partialorder %v172_v51, 0.7853982 }
  0x8d   :  { %v186_v61 = vand.u32 31, %v184_v60  ;;  %v78_v62 = vadd.s32 1, %v1000_v59  ;;  %v185_v1 = vshrl.u32 %v184_v60, 5  ;;  %v116_v45 = vshll.u32 %v76_v0, 8 }
  0x8f   :  { %v187_v2 = vsub.s32 32, %v186_v61  ;;  %vm79_vm3 = vcmp.gt.s32.totalorder %v78_v62, 0  ;;  %v189_v4 = vshll.u32 %v1301_v3, %v186_v61  ;;  %v192_v7 = vshll.u32 %v1302_v6, %v186_v61 }
  0x90   :  { %v80_v5 = vsel %vm79_vm3, %v78_v62, 0  ;;  %v195_v9 = vshll.u32 %v1303_v8, %v186_v61  ;;  %v198_v11 = vshll.u32 %v1304_v10, %v186_v61  ;;  %v201_v16 = vshll.u32 %v1305_v15, %v186_v61 }
  0x91   :  { %v1534_v12 = vshrl.u32 %v80_v5, 5  ;;  %v82_v13 = vand.u32 31, %v80_v5  ;;  %v190_v14 = vshrl.u32 %v1302_v6, %v187_v2  ;;  %v193_v17 = vshrl.u32 %v1303_v8, %v187_v2 }
  0x92   :  { %v196_v18 = vshrl.u32 %v1304_v10, %v187_v2  ;;  %v199_v19 = vshrl.u32 %v1305_v15, %v187_v2  ;;  %v202_v21 = vshrl.u32 %v1306_v20, %v187_v2  ;;  %v188_v25 = vshrl.u32 %v1301_v3, %v187_v2 }
  0x93   :  { %v83_v22 = vsub.s32 32, %v82_v13  ;;  %v94_v23 = vshll.u32 %v1304_v10, %v82_v13  ;;  %v97_v24 = vshll.u32 %v1305_v15, %v82_v13  ;;  %v191_v26 = vor.u32 %v190_v14, %v189_v4 }
  0x94   :  { %v194_v27 = vor.u32 %v193_v17, %v192_v7  ;;  %v197_v28 = vor.u32 %v196_v18, %v195_v9  ;;  %v200_v29 = vor.u32 %v199_v19, %v198_v11  ;;  %v203_v32 = vor.u32 %v202_v21, %v201_v16 }
  0x95   :  { %v95_v30 = vshrl.u32 %v1305_v15, %v83_v22  ;;  %v98_v31 = vshrl.u32 %v1306_v20, %v83_v22  ;;  %vm204_vm4 = vcmp.lt.s32.totalorder %v185_v1, 1  ;;  %vm206_vm5 = vcmp.lt.s32.totalorder %v185_v1, 3 }
  0x96   :  { %vm207_vm6 = vcmp.lt.s32.totalorder %v185_v1, 4  ;;  %v208_v33 = vsel %vm204_vm4, %v188_v25, %v191_v26  ;;  %v212_v38 = vsel %vm204_vm4, %v191_v26, %v194_v27  ;;  %v216_v41 = vsel %vm204_vm4, %v194_v27, %v197_v28 }
  0x97   :  { %v96_v35 = vor.u32 %v95_v30, %v94_v23  ;;  %v99_v36 = vor.u32 %v98_v31, %v97_v24  ;;  %v209_v37 = vsel %vm207_vm6, %v197_v28, 2102212464  ;;  %v213_v40 = vsel %vm207_vm6, %v200_v29, 920167782 }
  0x98   :  { %v210_v39 = vsel %vm206_vm5, %v194_v27, %v209_v37  ;;  %v217_v42 = vsel %vm207_vm6, %v203_v32, 1326507024  ;;  %vm103_vm7 = vcmp.lt.s32.totalorder %v1534_v12, 4  ;;  %vm205_vm8 = vcmp.lt.s32.totalorder %v185_v1, 2 }
  0x99   :  { %v214_v43 = vsel %vm206_vm5, %v197_v28, %v213_v40  ;;  %v109_v46 = vsel %vm103_vm7, %v96_v35, 920167782  ;;  %v113_v47 = vsel %vm103_vm7, %v99_v36, 1326507024  ;;  %v218_v49 = vsel %vm206_vm5, %v200_v29, %v217_v42 }
  0x9a   :  { %v215_v48 = vsel %vm205_vm8, %v212_v38, %v214_v43  ;;  %v211_v52 = vsel %vm205_vm8, %v208_v33, %v210_v39  ;;  %v219_v53 = vsel %vm205_vm8, %v216_v41, %v218_v49  ;;  %v85_v59 = vshll.u32 %v1301_v3, %v82_v13 }
  0x9b   :  { %v1545_v55 = vmul.u32.u64.low %v220_v34, %v215_v48  ;;  %v1546_v56 = vmul.u32.u64.high %v220_v34, %v215_v48, %v1545_v55  ;;  %v1548_v57 = vmul.u32.u64.low %v220_v34, %v219_v53  ;;  %v1549_v58 = vmul.u32.u64.high %v220_v34, %v219_v53, %v1548_v57 }
  0x9c   :  { %v86_v60 = vshrl.u32 %v1302_v6, %v83_v22  ;;  %v88_v61 = vshll.u32 %v1302_v6, %v82_v13  ;;  %v89_v62 = vshrl.u32 %v1303_v8, %v83_v22  ;;  %v91_v63 = vshll.u32 %v1303_v8, %v82_v13 }
  0x9d   :  { %v92_v0 = vshrl.u32 %v1304_v10, %v83_v22  ;;  %v227_v2 = vmul.u32 %v220_v34, %v211_v52  ;;  %v84_v4 = vshrl.u32 %v1301_v3, %v83_v22  ;;  %vm100_vm9 = vcmp.lt.s32.totalorder %v1534_v12, 1 }
  0x9e   :  { %v87_v1 = vor.u32 %v86_v60, %v85_v59  ;;  %v230_v5 = vadd.s32 1, %v1546_v56  ;;  %v90_v7 = vor.u32 %v89_v62, %v88_v61  ;;  %vm102_vm10 = vcmp.lt.s32.totalorder %v1534_v12, 3 }
  0x9f   :  { %v93_v9 = vor.u32 %v92_v0, %v91_v63  ;;  %vm229_vm11 = vc.u32 %v1549_v58, %v1545_v55  ;;  %vm101_vm12 = vcmp.lt.s32.totalorder %v1534_v12, 2  ;;  %v114_v8 = vsel %vm102_vm10, %v96_v35, %v113_v47 }
  0xa0   :  { %v104_v6 = vsel %vm100_vm9, %v84_v4, %v87_v1  ;;  %v231_v10 = vsel %vm229_vm11, %v230_v5, %v1546_v56  ;;  %v108_v11 = vsel %vm100_vm9, %v87_v1, %v90_v7  ;;  %v228_v41 = vadd.s32 %v1545_v55, %v1549_v58 }
  0xa1   :  { %v105_v3 = vsel %vm103_vm7, %v93_v9, 2102212464  ;;  %v110_v13 = vsel %vm102_vm10, %v93_v9, %v109_v46  ;;  %v232_v14 = vadd.s32 %v231_v10, %v227_v2  ;;  %v112_v17 = vsel %vm100_vm9, %v90_v7, %v93_v9 }
  0xa2   :  { %v106_v15 = vsel %vm102_vm10, %v90_v7, %v105_v3  ;;  %v111_v16 = vsel %vm101_vm12, %v108_v11, %v110_v13  ;;  %v115_v18 = vsel %vm101_vm12, %v112_v17, %v114_v8  ;;  %vm70_vm3 = vcmp.lt.s32.totalorder %v1524_v50, 0 }
  0xa3   :  { %v1567_v19 = vmul.u32.u64.low %v116_v45, %v111_v16  ;;  %v1568_v20 = vmul.u32.u64.high %v116_v45, %v111_v16, %v1567_v19  ;;  %v233_v21 = vadd.s32 536870912, %v232_v14  ;;  %v107_v24 = vsel %vm101_vm12, %v104_v6, %v106_v15 }
  0xa4   :  { %v1570_v22 = vmul.u32.u64.low %v116_v45, %v115_v18  ;;  %v1571_v23 = vmul.u32.u64.high %v116_v45, %v115_v18, %v1570_v22  ;;  %v123_v28 = vmul.u32 %v116_v45, %v107_v24  ;;  %vm69_vm4 = vcmp.le.f32.partialorder %v68_v54, 0.7853982 }
  0xa5   :  { %v234_v25 = vshrl.u32 %v233_v21, 30  ;;  %v126_v26 = vadd.s32 1, %v1568_v20  ;;  %vm333_vm8 = vcmask 1040384   ;;  %vm264_vm9 = vweird.f32 %v1521_v44 }
  0xa6   :  { %vm125_vm13 = vc.u32 %v1571_v23, %v1567_v19  ;;  %v124_v62 = vadd.s32 %v1567_v19, %v1571_v23 }
  0xa7   :  { %v235_v27 = vshll.u32 %v234_v25, 30  ;;  %v127_v29 = vsel %vm125_vm13, %v126_v26, %v1568_v20  ;;  %v258_v5 = vsub.s32 4, %v234_v25  ;;  %vm160_vm13 = vweird.f32 %v1524_v50 }
  0xa8   :  { %v128_v30 = vadd.s32 %v127_v29, %v123_v28 }
  0xa9   :  { %v236_v12 = vsub.s32 %v232_v14, %v235_v27  ;;  %v259_v3 = vsel %vm174_vm0, %v258_v5, %v234_v25 }
  0xaa   :  { %v129_v32 = vadd.s32 536870912, %v128_v30  ;;  %v261_v15 = vsel %vm173_vm2, 0, %v259_v3 }
  0xab   :  { %v238_v31 = vsub.s32 0, %v236_v12  ;;  %v265_v18 = vadd.s32 3, %v261_v15 }
  0xac   :  { %v130_v34 = vshrl.u32 %v129_v32, 30 }
  0xad   :  { %v1005_v33 = vmin.u32 %v238_v31, %v236_v12  ;;  %v266_v21 = vand.u32 3, %v265_v18 }
  0xae   :  { %v131_v36 = vshll.u32 %v130_v34, 30  ;;  %v154_v17 = vsub.s32 4, %v130_v34 }
  0xaf   :  { %v240_v35 = vclz %v1005_v33  ;;  %vm271_vm5 = vcmp.eq.s32.totalorder %v266_v21, 2  ;;  %vm268_vm6 = vcmp.eq.s32.totalorder %v266_v21, 0  ;;  %vm267_vm7 = vcmp.lt.s32.totalorder %v266_v21, 2 }
  0xb0   :  { %v132_v38 = vsub.s32 %v128_v30, %v131_v36  ;;  %v155_v20 = vsel %vm70_vm3, %v154_v17, %v130_v34 }
  0xb1   :  { %v1006_v37 = vadd.s32 4294967294, %v240_v35  ;;  %v157_v23 = vsel %vm69_vm4, 0, %v155_v20 }
  0xb2   :  { %v134_v40 = vsub.s32 0, %v132_v38  ;;  %v161_v28 = vadd.s32 3, %v157_v23 }
  0xb3   :  { %vm1007_vm14 = vcmp.lt.s32.totalorder %v1006_v37, 0 }
  0xb4   :  { %v243_v39 = vsel %vm1007_vm14, 0, %v1006_v37  ;;  %v1001_v45 = vmin.u32 %v134_v40, %v132_v38  ;;  %v162_v30 = vand.u32 3, %v161_v28  ;;  %v304_v40 = vld [vmem:[%s1664_s5 + $0x20] sm:$0xff]  ;;  %vm716_vm14 = vcmask 523264  }
  0xb5   :  { %v244_v42 = vsub.s32 32, %v243_v39  ;;  %v248_v43 = vsub.s32 4294967266, %v243_v39  ;;  %v245_v46 = vshll.u32 %v236_v12, %v243_v39  ;;  %v302_v39 = vld [vmem:[%s1664_s5 + $0x10] sm:$0xff] }
  0xb6   :  { %v136_v49 = vclz %v1001_v45  ;;  %vm167_vm10 = vcmp.eq.s32.totalorder %v162_v30, 2  ;;  %vm164_vm11 = vcmp.eq.s32.totalorder %v162_v30, 0  ;;  %vm163_vm12 = vcmp.lt.s32.totalorder %v162_v30, 2  ;;  %v660_v45 = vld [vmem:[%s1665_s6] sm:$0xff] }
  0xb7   :  { %v246_v47 = vshrl.u32 %v228_v41, %v244_v42  ;;  %v249_v48 = vadd.s32 127, %v248_v43  ;;  %v305_v41 = vld [vmem:[%s1664_s5 + $0x28] sm:$0xff]  ;;  %v306_v42 = vld [vmem:[%s1664_s5 + $0x30] sm:$0xff]  ;;  %v307_v43 = vld [vmem:[%s1664_s5 + $0x38] sm:$0xff] }
  0xb8   :  { %v1002_v56 = vadd.s32 4294967294, %v136_v49 }
  0xb9   :  { %v247_v52 = vor.u32 %v246_v47, %v245_v46  ;;  %v250_v53 = vshll.u32 %v249_v48, 23 }
  0xba   :  { %vm1003_vm15 = vcmp.lt.s32.totalorder %v1002_v56, 0 }
  0xbb   :  { %v251_v57 = vor.u32 4788187, %v250_v53  ;;  %v254_v60 = vcvt.s32.f32 %v247_v52  ;;  %v139_v61 = vsel %vm1003_vm15, 0, %v1002_v56 }
  0xbc   :  { %v140_v63 = vsub.s32 32, %v139_v61  ;;  %v144_v0 = vsub.s32 4294967266, %v139_v61  ;;  %v141_v58 = vshll.u32 %v132_v38, %v139_v61 }
  0xbd   :  { %v252_v59 = vand.u32 2147483647, %v251_v57 }
  0xbe   :  { %v142_v2 = vshrl.u32 %v124_v62, %v140_v63  ;;  %v145_v4 = vadd.s32 127, %v144_v0 }
  0xbf   :  { %v255_v55 = vmul.f32 %v254_v60, %v252_v59 }
  0xc0   :  { %v143_v7 = vor.u32 %v142_v2, %v141_v58  ;;  %v146_v9 = vshll.u32 %v145_v4, 23 }
  0xc1   :  { %v256_v1 = vxor.u32 2147483648, %v255_v55 }
  0xc2   :  { %v147_v10 = vor.u32 4788187, %v146_v9  ;;  %v150_v13 = vcvt.s32.f32 %v143_v7 }
  0xc3   :  { %v257_v6 = vsel %vm174_vm0, %v256_v1, %v255_v55 }
  0xc4   :  { %v260_v8 = vsel %vm173_vm2, %v1521_v44, %v257_v6  ;;  %v148_v11 = vand.u32 2147483647, %v147_v10  ;;  %v301_v44 = vld [vmem:[%s1664_s5 + $0x8] sm:$0xff] }
  0xc5   :  { %1238 = vcosq.f32 %v260_v8 }
  0xc6   :  { %1240 = vsinq.f32 %v260_v8  ;;  %v151_v14 = vmul.f32 %v150_v13, %v148_v11 }
  0xc8   :  { %v152_v16 = vxor.u32 2147483648, %v151_v14 }
  0xca   :  { %v153_v51 = vsel %vm70_vm3, %v152_v16, %v151_v14 }
  0xcb   :  { %v156_v19 = vsel %vm69_vm4, %v1524_v50, %v153_v51  ;;  %v303_v50 = vld [vmem:[%s1664_s5 + $0x18] sm:$0xff] }
  0xcc   :  { %1242 = vcosq.f32 %v156_v19 }
  0xcd   :  { %1244 = vsinq.f32 %v156_v19 }
  0xd2   :  { %v1239_v22 = vpop.eup %1238 }
  0xd3   :  { %v1241_v24 = vpop.eup %1240  ;;  %v272_v25 = vxor.u32 2147483648, %v1239_v22 }
  0xd4   :  { %v269_v26 = vxor.u32 2147483648, %v1241_v24 }
  0xd5   :  { %v273_v27 = vsel %vm271_vm5, %v272_v25, %v1241_v24 }
  0xd6   :  { %v270_v29 = vsel %vm268_vm6, %v1239_v22, %v269_v26 }
  0xd7   :  { %v274_v54 = vsel %vm267_vm7, %v270_v29, %v273_v27 }
  0xd8   :  { %v275_v12 = vsel %vm264_vm9, nan, %v274_v54 }
  0xd9   :  { %1111 = vmatprep.subr.msk.mxu0 %vm333_vm8, %v275_v12  ;;  %v1243_v31 = vpop.eup %1242 }
  0xda   :  { %1112 = vmatpush3.msk.msra.mxu0 %vm333_vm8, %v275_v12  ;;  %v1245_v32 = vpop.eup %1244  ;;  %v168_v33 = vxor.u32 2147483648, %v1243_v31 }
  0xdb   :  { %v165_v34 = vxor.u32 2147483648, %v1245_v32 }
  0xdc   :  { %v169_v35 = vsel %vm167_vm10, %v168_v33, %v1245_v32 }
  0xdd   :  { %v166_v36 = vsel %vm164_vm11, %v1243_v31, %v165_v34 }
  0xde   :  { %v170_v37 = vsel %vm163_vm12, %v166_v36, %v169_v35 }
  0xdf   :  { %v171_v38 = vsel %vm160_vm13, nan, %v170_v37 }
  0xe0   :  { %1113 = vmatprep.subr.mxu0 %v171_v38 }
  0xe1   :  { %1114 = vmatpush3.msra.mxu0 %v171_v38 }
  0xe2   :  { %1116 = vmatmul.mubr.msk.f32.vlgmr.msra.gmra.mxu0 %vm308_vm1, %v301_v44 }
  0xe3   :  { %1118 = vmatprep.mubr.msk.f32.mxu0 %vm308_vm1, %v302_v39 }
  0xe6   :  { %1119 = vmatmul.mubr.msk.f32.gmra.mxu0 %vm308_vm1, %v303_v50 }
  0xe7   :  { %1121 = vmatprep.mubr.msk.f32.mxu0 %vm308_vm1, %v304_v40 }
  0xea   :  { %1122 = vmatmul.mubr.msk.f32.gmra.mxu0 %vm308_vm1, %v305_v41 }
  0xeb   :  { %1124 = vmatprep.mubr.msk.f32.mxu0 %vm308_vm1, %v306_v42 }
  0xee   :  { %1125 = vmatmul.mubr.msk.f32.gmra.mxu0 %vm308_vm1, %v307_v43 }
  0xef   :  { %1187 = vmatprep.mubr.msk.f32.mxu0 %vm716_vm14, %v660_v45 }
 0x108   :  { %v1161_v46 = vpop.f32.mrf.mxu1 }
 0x10a   :  { %v581_v47 = vpop.f32.mrf.mxu1 }
 0x10c   :  { %v1164_v48 = vpop.f32.mrf.mxu1 }
 0x10e   :  { %v591_v49 = vpop.f32.mrf.mxu1 }
 0x110   :  { %v1167_v56 = vpop.f32.mrf.mxu1 }
 0x112   :  { %v601_v60 = vpop.f32.mrf.mxu1 }
 0x114   :  { %v1170_v55 = vpop.f32.mrf.mxu1 }
 0x116   :  { %v611_v6 = vpop.f32.mrf.mxu1 }
 0x1a2   :  { %v1117_v52 = vpop.f32.mrf.mxu0 }
 0x1a3   :  { %v587_v10 = vadd.f32 %v1161_v46, %v1117_v52  ;;  %v661_v46 = vld [vmem:[%s1665_s6 + $0x8] sm:$0xff] }
 0x1a4   :  { %v403_v53 = vpop.f32.mrf.mxu0  ;;  %v665_v52 = vld [vmem:[%s1665_s6 + $0x28] sm:$0xff] }
 0x1a5   :  { %v582_v13 = vadd.f32 %v581_v47, %v403_v53  ;;  %v621_v16 = vmul.f32 0.5, %v587_v10  ;;  %v662_v47 = vld [vmem:[%s1665_s6 + $0x10] sm:$0xff] }
 0x1a6   :  { %v1120_v57 = vpop.f32.mrf.mxu0  ;;  %v666_v53 = vld [vmem:[%s1665_s6 + $0x30] sm:$0xff] }
 0x1a7   :  { %v597_v63 = vadd.f32 %v1164_v48, %v1120_v57  ;;  %v620_v17 = vmul.f32 0.5, %v582_v13  ;;  %v663_v48 = vld [vmem:[%s1665_s6 + $0x18] sm:$0xff]  ;;  %v886_v57 = vld [vmem:[%s1666_s7] sm:$0xff] }
 0x1a8   :  { %v413_v59 = vpop.f32.mrf.mxu0 }
 0x1a9   :  { %v592_v1 = vadd.f32 %v591_v49, %v413_v59  ;;  %v623_v9 = vmul.f32 0.5, %v597_v63  ;;  %v664_v49 = vld [vmem:[%s1665_s6 + $0x20] sm:$0xff]  ;;  %v714_v59 = vpop.permute.xlu0 %713 }
 0x1aa   :  { %v1123_v61 = vpop.f32.mrf.mxu0 }
 0x1ab   :  { %v607_v62 = vadd.f32 %v1167_v56, %v1123_v61  ;;  %v622_v14 = vmul.f32 0.5, %v592_v1  ;;  %v667_v56 = vld [vmem:[%s1665_s6 + $0x38] sm:$0xff] }
 0x1ac   :  { %v423_v0 = vpop.f32.mrf.mxu0 }
 0x1ad   :  { %v625_v58 = vmul.f32 0.5, %v607_v62  ;;  %v602_v2 = vadd.f32 %v601_v60, %v423_v0  ;;  %v709_v60 = vpop.permute.xlu1 %708 }
 0x1ae   :  { %v1126_v4 = vpop.f32.mrf.mxu0 }
 0x1af   :  { %v624_v5 = vmul.f32 0.5, %v602_v2  ;;  %v617_v7 = vadd.f32 %v1170_v55, %v1126_v4  ;;  %1246 = vtanh.f32 %v625_v58 }
 0x1b0   :  { %v433_v8 = vpop.f32.mrf.mxu0 }
 0x1b1   :  { %v627_v3 = vmul.f32 0.5, %v617_v7  ;;  %v612_v11 = vadd.f32 %v611_v6, %v433_v8  ;;  %1248 = vtanh.f32 %v624_v5  ;;  %v699_v0 = vpop.permute.xlu1 %698 }
 0x1b3   :  { %1250 = vtanh.f32 %v627_v3  ;;  %v626_v15 = vmul.f32 0.5, %v612_v11 }
 0x1b4   :  { %1252 = vtanh.f32 %v623_v9 }
 0x1b5   :  { %1254 = vtanh.f32 %v626_v15  ;;  %v689_v5 = vpop.permute.xlu1 %688 }
 0x1b6   :  { %1256 = vtanh.f32 %v622_v14 }
 0x1b7   :  { %1258 = vtanh.f32 %v621_v16 }
 0x1b8   :  { %1260 = vtanh.f32 %v620_v17 }
 0x1bc   :  { %v1247_v18 = vpop.eup %1246 }
 0x1bd   :  { %v641_v21 = vmul.f32 0.5, %v1247_v18 }
 0x1be   :  { %v1249_v51 = vpop.eup %1248 }
 0x1bf   :  { %v640_v24 = vmul.f32 0.5, %v1249_v51  ;;  %v649_v29 = vadd.f32 0.5, %v641_v21 }
 0x1c0   :  { %v1251_v19 = vpop.eup %1250 }
 0x1c1   :  { %v1253_v20 = vpop.eup %1252  ;;  %v643_v22 = vmul.f32 0.5, %v1251_v19  ;;  %v648_v32 = vadd.f32 0.5, %v640_v24  ;;  %v657_v37 = vmul.f32 %v649_v29, %v607_v62  ;;  %v704_v62 = vpop.permute.xlu0 %703 }
 0x1c2   :  { %v1255_v23 = vpop.eup %1254  ;;  %v639_v28 = vmul.f32 0.5, %v1253_v20  ;;  %v679_v19 = vpop.permute.xlu1 %678 }
 0x1c3   :  { %v651_v25 = vadd.f32 0.5, %v643_v22  ;;  %v642_v26 = vmul.f32 0.5, %v1255_v23  ;;  %v1257_v27 = vpop.eup %1256  ;;  %v656_v39 = vmul.f32 %v648_v32, %v602_v2 }
 0x1c4   :  { %v1259_v30 = vpop.eup %1258  ;;  %v638_v31 = vmul.f32 0.5, %v1257_v27  ;;  %v647_v36 = vadd.f32 0.5, %v639_v28 }
 0x1c5   :  { %v659_v54 = vmul.f32 %v651_v25, %v617_v7  ;;  %v650_v12 = vadd.f32 0.5, %v642_v26  ;;  %v1261_v34 = vpop.eup %1260  ;;  %v637_v35 = vmul.f32 0.5, %v1259_v30  ;;  %v694_v2 = vpop.permute.xlu0 %693 }
 0x1c6   :  { %v636_v38 = vmul.f32 0.5, %v1261_v34  ;;  %v646_v44 = vadd.f32 0.5, %v638_v31  ;;  %v655_v40 = vmul.f32 %v647_v36, %v597_v63 }
 0x1c7   :  { %v658_v33 = vmul.f32 %v650_v12, %v612_v11  ;;  %1171 = vmatprep.subr.mxu0 %v659_v54  ;;  %v645_v50 = vadd.f32 0.5, %v637_v35 }
 0x1c8   :  { %1172 = vmatpush3.msra.mxu0 %v659_v54  ;;  %v644_v41 = vadd.f32 0.5, %v636_v38  ;;  %v654_v42 = vmul.f32 %v646_v44, %v592_v1 }
 0x1c9   :  { %1173 = vmatprep.subr.mxu0 %v658_v33  ;;  %v653_v43 = vmul.f32 %v645_v50, %v587_v10  ;;  %v684_v14 = vpop.permute.xlu0 %683 }
 0x1ca   :  { %1174 = vmatpush3.msra.mxu0 %v658_v33  ;;  %v652_v45 = vmul.f32 %v644_v41, %v582_v13 }
 0x1cb   :  { %1175 = vmatprep.subr.mxu0 %v657_v37 }
 0x1cc   :  { %1176 = vmatpush3.msra.mxu0 %v657_v37 }
 0x1cd   :  { %1177 = vmatprep.subr.mxu0 %v656_v39 }
 0x1ce   :  { %1178 = vmatpush3.msra.mxu0 %v656_v39 }
 0x1cf   :  { %1179 = vmatprep.subr.mxu0 %v655_v40 }
 0x1d0   :  { %1180 = vmatpush3.msra.mxu0 %v655_v40 }
 0x1d1   :  { %1181 = vmatprep.subr.mxu0 %v654_v42 }
 0x1d2   :  { %1182 = vmatpush3.msra.mxu0 %v654_v42 }
 0x1d3   :  { %1183 = vmatprep.subr.mxu0 %v653_v43 }
 0x1d4   :  { %1184 = vmatpush3.msra.mxu0 %v653_v43 }
 0x1d5   :  { %1185 = vmatprep.subr.mxu0 %v652_v45 }
 0x1d6   :  { %1186 = vmatpush3.msra.mxu0 %v652_v45 }
 0x1d7   :  { %1188 = vmatmul.mubr.msk.f32.vlgmr.msra.gmra.mxu0 %vm716_vm14, %v661_v46 }
 0x1d8   :  { %1190 = vmatprep.mubr.msk.f32.mxu0 %vm716_vm14, %v662_v47 }
 0x1db   :  { %1191 = vmatmul.mubr.msk.f32.gmra.mxu0 %vm716_vm14, %v663_v48 }
 0x1dc   :  { %1193 = vmatprep.mubr.msk.f32.mxu0 %vm716_vm14, %v664_v49 }
 0x1df   :  { %1194 = vmatmul.mubr.msk.f32.gmra.mxu0 %vm716_vm14, %v665_v52 }
 0x1e0   :  { %1196 = vmatprep.mubr.msk.f32.mxu0 %vm716_vm14, %v666_v53 }
 0x1e3   :  { %1197 = vmatmul.mubr.msk.f32.gmra.mxu0 %vm716_vm14, %v667_v56 }
 0x1e4   :  { %1215 = vmatprep.mubr.msk.f32.mxu0 %vm716_vm14, %v886_v57 }
 0x297   :  { %v1189_v61 = vpop.f32.mrf.mxu0 }
 0x298   :  { %v813_v17 = vadd.f32 %v1189_v61, %v684_v14 }
 0x299   :  { %v807_v63 = vpop.f32.mrf.mxu0 }
 0x29a   :  { %v808_v20 = vadd.f32 %v807_v63, %v679_v19  ;;  %v847_v23 = vmul.f32 0.5, %v813_v17  ;;  %v893_v63 = vpop.permute.xlu0 %892 }
 0x29b   :  { %v1192_v55 = vpop.f32.mrf.mxu0 }
 0x29c   :  { %v823_v7 = vadd.f32 %v1192_v55, %v694_v2  ;;  %v846_v24 = vmul.f32 0.5, %v808_v20 }
 0x29d   :  { %v817_v58 = vpop.f32.mrf.mxu0 }
 0x29e   :  { %v818_v3 = vadd.f32 %v817_v58, %v689_v5  ;;  %v849_v15 = vmul.f32 0.5, %v823_v7 }
 0x29f   :  { %v1195_v4 = vpop.f32.mrf.mxu0 }
 0x2a0   :  { %v833_v1 = vadd.f32 %v1195_v4, %v704_v62  ;;  %v848_v21 = vmul.f32 0.5, %v818_v3 }
 0x2a1   :  { %v827_v9 = vpop.f32.mrf.mxu0 }
 0x2a2   :  { %v851_v6 = vmul.f32 0.5, %v833_v1  ;;  %v828_v8 = vadd.f32 %v827_v9, %v699_v0 }
 0x2a3   :  { %v1198_v10 = vpop.f32.mrf.mxu0 }
 0x2a4   :  { %v850_v11 = vmul.f32 0.5, %v828_v8  ;;  %v843_v13 = vadd.f32 %v1198_v10, %v714_v59  ;;  %1262 = vtanh.f32 %v851_v6  ;;  %v887_v59 = vld [vmem:[%s1666_s7 + $0x8] sm:$0xff] }
 0x2a5   :  { %v837_v16 = vpop.f32.mrf.mxu0 }
 0x2a6   :  { %v853_v18 = vmul.f32 0.5, %v843_v13  ;;  %v838_v51 = vadd.f32 %v837_v16, %v709_v60  ;;  %1264 = vtanh.f32 %v850_v11  ;;  %v898_v60 = vpop.permute.xlu1 %897 }
 0x2a8   :  { %1266 = vtanh.f32 %v853_v18  ;;  %v852_v22 = vmul.f32 0.5, %v838_v51 }
 0x2a9   :  { %1268 = vtanh.f32 %v849_v15 }
 0x2aa   :  { %1270 = vtanh.f32 %v852_v22 }
 0x2ab   :  { %1272 = vtanh.f32 %v848_v21 }
 0x2ac   :  { %1274 = vtanh.f32 %v847_v23 }
 0x2ad   :  { %1276 = vtanh.f32 %v846_v24 }
 0x2b1   :  { %v1263_v25 = vpop.eup %1262 }
 0x2b2   :  { %v867_v29 = vmul.f32 0.5, %v1263_v25 }
 0x2b3   :  { %v1265_v26 = vpop.eup %1264 }
 0x2b4   :  { %v866_v30 = vmul.f32 0.5, %v1265_v26  ;;  %v875_v35 = vadd.f32 0.5, %v867_v29 }
 0x2b5   :  { %v1267_v27 = vpop.eup %1266 }
 0x2b6   :  { %v1269_v28 = vpop.eup %1268  ;;  %v869_v54 = vmul.f32 0.5, %v1267_v27  ;;  %v874_v39 = vadd.f32 0.5, %v866_v30  ;;  %v883_v43 = vmul.f32 %v875_v35, %v833_v1 }
 0x2b7   :  { %v1271_v12 = vpop.eup %1270  ;;  %v865_v34 = vmul.f32 0.5, %v1269_v28 }
 0x2b8   :  { %v877_v31 = vadd.f32 0.5, %v869_v54  ;;  %v868_v32 = vmul.f32 0.5, %v1271_v12  ;;  %v1273_v33 = vpop.eup %1272  ;;  %v882_v47 = vmul.f32 %v874_v39, %v828_v8 }
 0x2b9   :  { %v1275_v38 = vpop.eup %1274  ;;  %v864_v44 = vmul.f32 0.5, %v1273_v33  ;;  %v873_v42 = vadd.f32 0.5, %v865_v34 }
 0x2ba   :  { %v885_v36 = vmul.f32 %v877_v31, %v843_v13  ;;  %v876_v37 = vadd.f32 0.5, %v868_v32  ;;  %v1277_v40 = vpop.eup %1276  ;;  %v863_v41 = vmul.f32 0.5, %v1275_v38 }
 0x2bb   :  { %v862_v45 = vmul.f32 0.5, %v1277_v40  ;;  %v872_v46 = vadd.f32 0.5, %v864_v44  ;;  %v881_v49 = vmul.f32 %v873_v42, %v823_v7 }
 0x2bc   :  { %v884_v50 = vmul.f32 %v876_v37, %v838_v51  ;;  %1199 = vmatprep.subr.mxu0 %v885_v36  ;;  %v871_v48 = vadd.f32 0.5, %v863_v41 }
 0x2bd   :  { %1200 = vmatpush3.msra.mxu0 %v885_v36  ;;  %v870_v52 = vadd.f32 0.5, %v862_v45  ;;  %v880_v53 = vmul.f32 %v872_v46, %v818_v3 }
 0x2be   :  { %1201 = vmatprep.subr.mxu0 %v884_v50  ;;  %v879_v56 = vmul.f32 %v871_v48, %v813_v17 }
 0x2bf   :  { %1202 = vmatpush3.msra.mxu0 %v884_v50  ;;  %v878_v57 = vmul.f32 %v870_v52, %v808_v20 }
 0x2c0   :  { %1203 = vmatprep.subr.mxu0 %v883_v43 }
 0x2c1   :  { %1204 = vmatpush3.msra.mxu0 %v883_v43 }
 0x2c2   :  { %1205 = vmatprep.subr.mxu0 %v882_v47 }
 0x2c3   :  { %1206 = vmatpush3.msra.mxu0 %v882_v47 }
 0x2c4   :  { %1207 = vmatprep.subr.mxu0 %v881_v49 }
 0x2c5   :  { %1208 = vmatpush3.msra.mxu0 %v881_v49 }
 0x2c6   :  { %1209 = vmatprep.subr.mxu0 %v880_v53 }
 0x2c7   :  { %1210 = vmatpush3.msra.mxu0 %v880_v53 }
 0x2c8   :  { %1211 = vmatprep.subr.mxu0 %v879_v56 }
 0x2c9   :  { %1212 = vmatpush3.msra.mxu0 %v879_v56 }
 0x2ca   :  { %1213 = vmatprep.subr.mxu0 %v878_v57 }
 0x2cb   :  { %1214 = vmatpush3.msra.mxu0 %v878_v57 }
 0x2cc   :  { %1216 = vmatmul.mubr.msk.f32.vlgmr.msra.gmra.mxu0 %vm716_vm14, %v887_v59 }
 0x38c   :  { %v1217_v61 = vpop.f32.mrf.mxu0 }
 0x38d   :  { %v978_v62 = vadd.f32 %v1217_v61, %v898_v60 }
 0x38e   :  { %v972_v0 = vpop.f32.mrf.mxu0 }
 0x38f   :  { %982 = vst [vmem:[#allocation2 + $0x8] sm:$0xff] %v978_v62  ;;  %v973_v55 = vadd.f32 %v972_v0, %v893_v63 }
 0x391   :  { %981 = vst [vmem:[#allocation2] sm:$0xff] %v973_v55 }
 0x392   :  { %1289 = shalt.err (!%p1286_p4)
}
 0x393   :  { %s1308_s7 = smov 128   ;;  %s1309_s22 = smov 8  }
 0x394   :  { %994 = dma.vmem_to_hbm [thread:$0]  %s989_s20, 256, %s1668_s9, [#allocation3], %s1308_s7, %s1308_s7, %s1309_s22  }
 0x395   :  { %1298 = dma.done.wait [#allocation3], 256  }
 0x396   :  { %1299 = vsyncadd [#allocation3], 4294967040 }
 0x397   :  { %998 = vsyncpa [#allocation3], 1 }

</bundles_post_ra>
